<compile_context>
chip_gen: v7x
topology: tpu7x:2x2x1
jax: 0.10.0
libtpu: 0.0.40
codegen_flags: <defaults>
</compile_context>

<pallas_src>
import jax
import jax.numpy as jnp
from jax.experimental import pallas as pl
from jax.experimental.pallas import tpu as pltpu


def prj_kernel(w_ref, x_cmp_ref, x_res_ref, proj_ref, a_ref, out_ref):
    # w_ref:     SMEM scalar weight, shape (1,) f32
    # x_cmp_ref: [tb, N]  A-compute-dtype flattened image (resident across k)
    # x_res_ref: [tb, N]  f32 flattened image for the exact residual add
    # proj_ref:  [tb, tp] f32 measured-projection chunk for this k step
    # a_ref:     [tp, N]  projection-matrix chunk (rows = rays), streamed
    # out_ref:   [tb, N]  f32 output tile; doubles as the x_error accumulator
    k = pl.program_id(1)

    # Initialise the resident output tile with the residual: out = x + sum_k w*dx_k
    @pl.when(k == 0)
    def _():
        out_ref[...] = x_res_ref[...]

    a = a_ref[...]                                    # [tp, N]

    # forward_module chunk: p_tmp = x @ A_chunk^T   (contract last dims, MXU)
    p_tmp = jax.lax.dot_general(
        x_cmp_ref[...], a, (((1,), (1,)), ((), ())),
        preferred_element_type=jnp.float32)           # [tb, tp] f32

    # y_error chunk, with the scalar weight folded in while the tensor is small
    y_err = (proj_ref[...] - p_tmp) * w_ref[0]        # [tb, tp] f32

    # backward_module partial sum: out += (w * y_err) @ A_chunk   (adjoint)
    out_ref[...] += jax.lax.dot_general(
        y_err.astype(a_ref.dtype), a, (((1,), (0,)), ((), ())),
        preferred_element_type=jnp.float32)           # [tb, N] f32


def _vmem_budget(tb, N, a_itemsize):
    """Generation-aware (vmem_limit_bytes, per-A-buffer budget)."""
    try:
        cap = int(pltpu.get_tpu_info().vmem_capacity_bytes)
    except Exception:
        cap = 64 * 1024 * 1024                         # conservative (v7x floor)
    vmem_limit = (cap * 3) // 4                        # ~48 MiB v7x, ~96 MiB v5e/v6e
    # Resident, double-buffered per-batch-tile arrays: x_cmp + x_res + out.
    resident = 2 * tb * N * (a_itemsize + 4 + 4)
    headroom = 4 * 1024 * 1024                         # Mosaic internal scratch, proj chunk
    a_budget = min((vmem_limit - resident - headroom) // 2, vmem_limit // 4)
    return vmem_limit, max(a_budget, 0)


def _pick_p_tile(P, N, a_itemsize, per_buffer_budget):
    """Largest lane-aligned P tile dividing P whose A chunk fits one buffer."""
    if P * N * a_itemsize <= per_buffer_budget:
        return P                                       # whole A fits: single step
    if P % 128 == 0:
        max_rows = per_buffer_budget // max(1, N * a_itemsize)
        tp = (max_rows // 128) * 128
        if tp >= 128:
            tp = min(tp, P)
            while P % tp:
                tp -= 128
            return tp
    # TODO(synk): two-pass N-tiling for images where even a 128-row A chunk
    # exceeds the per-buffer VMEM budget.
    raise ValueError(
        f"A chunk does not fit VMEM (P={P}, N={N}, budget={per_buffer_budget}B); "
        "N-tiling not implemented.")


def prj_module_pallas(input_data, proj, A, weight, *, tp=None, tb=None,
                      a_dtype=jnp.bfloat16):
    """input_data: [B,C,H,W], proj: [B,C,V,D], A: [C*V*D, C*H*W], weight: scalar."""
    B, C, H, W = input_data.shape
    _, _, V, D = proj.shape
    N = C * H * W
    P = C * V * D
    assert A.shape == (P, N)

    a_itemsize = jnp.dtype(a_dtype).itemsize
    x_res = input_data.reshape(B, N).astype(jnp.float32)   # exact residual path
    x_cmp = x_res.astype(a_dtype)                           # cast once, not per step
    proj_flat = proj.reshape(B, P).astype(jnp.float32)
    a_cast = A.astype(a_dtype)                               # dominant HBM stream
    # TODO(synk): original nn.Parameter can broadcast per-element; scalar only here.
    w = jnp.asarray(weight, jnp.float32).reshape(1)

    if tb is None:
        # Use both TensorCores (megacore) when half-batch tiles stay sublane-aligned.
        tb = B // 2 if (B % 2 == 0 and (B // 2) % 8 == 0) else B
    assert B % tb == 0, "batch tile must divide B"

    vmem_limit, a_budget = _vmem_budget(tb, N, a_itemsize)
    if tp is None:
        tp = _pick_p_tile(P, N, a_itemsize, a_budget)
    assert P % tp == 0, "P tile must divide P"

    grid = (B // tb, P // tp)

    out_flat = pl.pallas_call(
        prj_kernel,
        out_shape=jax.ShapeDtypeStruct((B, N), jnp.float32),
        grid_spec=pltpu.PrefetchScalarGridSpec(
            num_scalar_prefetch=0,
            grid=grid,
            in_specs=[
                pl.BlockSpec(memory_space=pltpu.MemorySpace.SMEM),   # weight
                pl.BlockSpec((tb, N), lambda i, k: (i, 0)),          # x (compute dtype)
                pl.BlockSpec((tb, N), lambda i, k: (i, 0)),          # x (f32 residual)
                pl.BlockSpec((tb, tp), lambda i, k: (i, k)),         # proj chunk
                pl.BlockSpec((tp, N), lambda i, k: (k, 0)),          # A chunk (streamed)
            ],
            out_specs=pl.BlockSpec((tb, N), lambda i, k: (i, 0)),    # resident accumulator
        ),
        compiler_params=pltpu.CompilerParams(
            dimension_semantics=("parallel", "arbitrary"),
            vmem_limit_bytes=int(vmem_limit),
        ),
    )(w, x_cmp, x_res, proj_flat, a_cast)

    return out_flat.reshape(B, C, H, W)


def prj_module_ref(input_data, proj, A, weight):
    """Pure-JAX f32 reference mirroring the PyTorch forward."""
    B = input_data.shape[0]
    x_flat = input_data.reshape(B, -1).astype(jnp.float32)
    proj_flat = proj.reshape(B, -1).astype(jnp.float32)
    A = A.astype(jnp.float32)
    p_tmp = x_flat @ A.T
    y_err = proj_flat - p_tmp
    x_err = y_err @ A
    return (weight * x_err + x_flat).reshape(input_data.shape)


if __name__ == "__main__":
    # Small CT-like shapes: image 1x16x16 (N=256), sinogram 8 views x 32 dets (P=256).
    B, C, H, W = 2, 1, 16, 16
    V, D = 8, 32
    N, P = C * H * W, C * V * D

    key = jax.random.PRNGKey(0)
    k1, k2, k3 = jax.random.split(key, 3)
    input_data = jax.random.normal(k1, (B, C, H, W), jnp.float32)
    proj = jax.random.normal(k2, (B, C, V, D), jnp.float32)
    A = jax.random.normal(k3, (P, N), jnp.float32) / jnp.sqrt(N)

    ref0 = prj_module_ref(input_data, proj, A, 0.0)
    ref2 = prj_module_ref(input_data, proj, A, 0.25)

    # Module init: self.weight.data.zero_() -> out == input exactly (w folds to 0).
    out0 = prj_module_pallas(input_data, proj, A, 0.0, tp=128)   # 2 reduction steps
    jax.block_until_ready(out0)
    assert jnp.allclose(out0, ref0, atol=1e-6, rtol=1e-6)

    # Trained-like weight, bf16 A stream with f32 accumulation.
    out2 = prj_module_pallas(input_data, proj, A, 0.25, tp=128)
    jax.block_until_ready(out2)
    assert jnp.allclose(out2, ref2, atol=5e-2, rtol=5e-2)

    # Auto tile picker (whole-A single step for these sizes).
    out3 = prj_module_pallas(input_data, proj, A, 0.25)
    jax.block_until_ready(out3)
    assert jnp.allclose(out3, ref2, atol=5e-2, rtol=5e-2)

    # f32-A accuracy fallback.
    out4 = prj_module_pallas(input_data, proj, A, 0.25, a_dtype=jnp.float32)
    jax.block_until_ready(out4)
    assert jnp.allclose(out4, ref2, atol=1e-3, rtol=1e-3)

    print("KERNEL_OK")
</pallas_src>

<mosaic_0001>
module attributes {stable_mosaic.version = 11 : i64} {
  func.func @prj_kernel(%arg0: i32, %arg1: i32, %arg2: memref<1xf32, #tpu.memory_space<smem>>, %arg3: memref<2x256xbf16, #tpu.memory_space<vmem>>, %arg4: memref<2x256xf32, #tpu.memory_space<vmem>>, %arg5: memref<2x128xf32, #tpu.memory_space<vmem>>, %arg6: memref<128x256xbf16, #tpu.memory_space<vmem>>, %arg7: memref<2x256xf32, #tpu.memory_space<vmem>>) attributes {dimension_semantics = [#tpu.dimension_semantics<parallel>, #tpu.dimension_semantics<arbitrary>], iteration_bounds = array<i64: 1, 2>, scalar_prefetch = 0 : i64, scratch_operands = 0 : i64, tpu.core_type = #tpu.core_type<tc>, window_params = [{transform_indices = @transform_0, window_bounds = array<i64: 1>}, {transform_indices = @transform_1, window_bounds = array<i64: 2, 256>}, {transform_indices = @transform_2, window_bounds = array<i64: 2, 256>}, {transform_indices = @transform_3, window_bounds = array<i64: 2, 128>}, {transform_indices = @transform_4, window_bounds = array<i64: 128, 256>}, {transform_indices = @transform_5, window_bounds = array<i64: 2, 256>}]} {
    %c0_i32 = arith.constant 0 : i32
    %0 = arith.cmpi eq, %arg1, %c0_i32 : i32
    %1 = arith.extui %0 : i1 to i32
    %c0_i32_0 = arith.constant 0 : i32
    %2 = arith.cmpi ne, %1, %c0_i32_0 : i32
    scf.if %2 {
      %c0_12 = arith.constant 0 : index
      %c0_13 = arith.constant 0 : index
      %16 = vector.load %arg4[%c0_12, %c0_13] : memref<2x256xf32, #tpu.memory_space<vmem>>, vector<2x256xf32>
      %c0_14 = arith.constant 0 : index
      %c0_15 = arith.constant 0 : index
      %17 = vector.load %arg7[%c0_14, %c0_15] : memref<2x256xf32, #tpu.memory_space<vmem>>, vector<2x256xf32>
      tpu.vector_store %arg7[%c0_14, %c0_15], %16 {strides = array<i32>} : memref<2x256xf32, #tpu.memory_space<vmem>>, vector<2x256xf32>,
    } else {
    }
    %c0 = arith.constant 0 : index
    %c0_1 = arith.constant 0 : index
    %3 = vector.load %arg6[%c0, %c0_1] : memref<128x256xbf16, #tpu.memory_space<vmem>>, vector<128x256xbf16>
    %c0_2 = arith.constant 0 : index
    %c0_3 = arith.constant 0 : index
    %4 = vector.load %arg3[%c0_2, %c0_3] : memref<2x256xbf16, #tpu.memory_space<vmem>>, vector<2x256xbf16>
    %cst = arith.constant dense<0.000000e+00> : vector<2x128xf32>
    %5 = tpu.matmul %4, %3, %cst {dimension_numbers = #tpu.dot_dimension_numbers<[1], [1], [0], [0], [0, 0, 1, 0], [], []>} : vector<2x256xbf16>, vector<128x256xbf16>, vector<2x128xf32> -> vector<2x128xf32>
    %c0_4 = arith.constant 0 : index
    %c0_5 = arith.constant 0 : index
    %6 = vector.load %arg5[%c0_4, %c0_5] : memref<2x128xf32, #tpu.memory_space<vmem>>, vector<2x128xf32>
    %7 = arith.subf %6, %5 : vector<2x128xf32>
    %c0_6 = arith.constant 0 : index
    %8 = memref.load %arg2[%c0_6] : memref<1xf32, #tpu.memory_space<smem>>
    %9 = vector.broadcast %8 : f32 to vector<2x128xf32>
    %10 = arith.mulf %7, %9 : vector<2x128xf32>
    %c0_7 = arith.constant 0 : index
    %c0_8 = arith.constant 0 : index
    %11 = vector.load %arg7[%c0_7, %c0_8] : memref<2x256xf32, #tpu.memory_space<vmem>>, vector<2x256xf32>
    %12 = arith.truncf %10 : vector<2x128xf32> to vector<2x128xbf16>
    %cst_9 = arith.constant dense<0.000000e+00> : vector<2x256xf32>
    %13 = tpu.matmul %12, %3, %cst_9 {dimension_numbers = #tpu.dot_dimension_numbers<[1], [0], [0], [1], [0, 0, 1, 1], [], []>} : vector<2x128xbf16>, vector<128x256xbf16>, vector<2x256xf32> -> vector<2x256xf32>
    %14 = arith.addf %11, %13 : vector<2x256xf32>
    %c0_10 = arith.constant 0 : index
    %c0_11 = arith.constant 0 : index
    %15 = vector.load %arg7[%c0_10, %c0_11] : memref<2x256xf32, #tpu.memory_space<vmem>>, vector<2x256xf32>
    tpu.vector_store %arg7[%c0_10, %c0_11], %14 {strides = array<i32>} : memref<2x256xf32, #tpu.memory_space<vmem>>, vector<2x256xf32>,
    return
  }
  func.func @transform_0(%arg0: i32, %arg1: i32) -> i32 {
    %c0_i32 = arith.constant 0 : i32
    %c0_i32_0 = arith.constant 0 : i32
    return %c0_i32 : i32
  }
  func.func @transform_1(%arg0: i32, %arg1: i32) -> (i32, i32) {
    %c0_i32 = arith.constant 0 : i32
    %c0_i32_0 = arith.constant 0 : i32
    return %arg0, %c0_i32 : i32, i32
  }
  func.func @transform_2(%arg0: i32, %arg1: i32) -> (i32, i32) {
    %c0_i32 = arith.constant 0 : i32
    %c0_i32_0 = arith.constant 0 : i32
    return %arg0, %c0_i32 : i32, i32
  }
  func.func @transform_3(%arg0: i32, %arg1: i32) -> (i32, i32) {
    %c0_i32 = arith.constant 0 : i32
    return %arg0, %arg1 : i32, i32
  }
  func.func @transform_4(%arg0: i32, %arg1: i32) -> (i32, i32) {
    %c0_i32 = arith.constant 0 : i32
    %c0_i32_0 = arith.constant 0 : i32
    return %arg1, %c0_i32 : i32, i32
  }
  func.func @transform_5(%arg0: i32, %arg1: i32) -> (i32, i32) {
    %c0_i32 = arith.constant 0 : i32
    %c0_i32_0 = arith.constant 0 : i32
    return %arg0, %c0_i32 : i32, i32
  }
}

</mosaic_0001>

<bundles_post_ra>
// kernel: tpu_custom_call.1
= control target key start
LH: loop header
LB: loop body
LE: loop exit
PB: predicated region body
PF: predicated region fallthrough
CT: control target
= control target key end

     0   :  { %s1129_s0 = inlined_call_operand.<no memory space> [shape: f32[1], index: 0, kind: input, shape index: {}]   ;;  %s1130_s1 = inlined_call_operand.vmem [shape: bf16[2,256], index: 1, kind: input, shape index: {}]   ;;  %s1131_s2 = inlined_call_operand.vmem [shape: f32[2,256], index: 2, kind: input, shape index: {}]   ;;  %s1132_s3 = inlined_call_operand.vmem [shape: f32[2,256], index: 3, kind: input, shape index: {}]   ;;  %s1133_s4 = inlined_call_operand.hbm [shape: bf16[256,256], index: 4, kind: input, shape index: {}]   ;;  %s1134_s5 = inlined_call_operand.hbm [shape: f32[2,256], index: 5, kind: output, shape index: {}]  }
   0x1   :  { %10 = sst [smem:[#allocation2]] %s1129_s0 }
   0x2   :  { %11 = vsyncpa [#allocation4], 0 }
   0x3   :  { %13 = vsyncpa [#allocation4 + $0x1], 0 }
   0x4   :  { %14 = vsyncpa [#allocation5], 0  ;;  %s947_s20 = smov 0   ;;  %s949_s21 = smov 0  }
   0x5   :  { %s951_s22 = smov 0   ;;  %s953_s23 = smov 0  }
   0x6   :  { %s955_s24 = smov 0   ;;  %s957_s25 = smov 0  }
   0x7 LB: > { %s668_s0 = sadd.s32 4294967295, %s905_s25   ;;  %s29_s26 = sadd.s32 1, %s901_s24  ;;  %s905_s25 = sphi %s957_s25, %s20_s25   ;;  %s901_s24 = sphi %s955_s24, %s1143_s24   ;;  %s897_s23 = sphi %s953_s23, %s1142_s23   ;;  %s893_s22 = sphi %s951_s22, %s1141_s22   ;;  %s889_s21 = sphi %s949_s21, %s1140_s21   ;;  %s885_s20 = sphi %s947_s20, %s1139_s20  }
   0x8   : > { %p30_p0 = scmp.ge.s32.totalorder %s29_s26, 2  ;;  %s140_s27 = sadd.s32 1, %s893_s22 }
   0x9   : > { %p147_p1 = scmp.ne.s32.totalorder %s893_s22, %s889_s21  ;;  %p148_p2 = scmp.eq.s32.totalorder %s905_s25, 0 }
   0xa   : > { %s1145_s26 = smov (%p30_p0, %s29_s26), 0  ;;  %p153_p4 = scmp.ne.s32.totalorder %s889_s21, %s885_s20 }
   0xb   : > { %p983_p3 = por %p148_p2, %p147_p1  ;;  %s137_s29 = ssub.s32 %s901_s24, %s1145_s26 }
   0xc   : > { %p154_p5 = scmp.eq.s32.totalorder %s668_s0, 0  ;;  %p138_p6 = scmp.eq.s32.totalorder %s137_s29, 0 }
   0xd   : > { %p714_p8 = scmp.lt.s32.totalorder %s905_s25, 2  ;;  %s232_s7 = sand.u32 1, %s893_s22  }
   0xe   : > { %p992_p7 = por %p154_p5, %p153_p4  ;;  %s703_s8 = sshll.u32 %s901_s24, 11 }
   0xf   : > { %s998_s6 = scalar_select %p138_p6, %s893_s22, %s140_s27  }
  0x10   : > { %s673_s9 = sshll.u32 %s232_s7, 7  ;;  %s1005_s12 = scalar_lea.hbm %s1133_s4, %s703_s8 }
  0x11   : > { %s236_s13 = scalar_lea.vmem [#allocation3], %s673_s9  ;;  %p1009_p9 = pnand %p714_p8, %p983_p3 }
  0x12   : > { %s244_s14 = sshll.u32 %s236_s13, 4  ;;  %s1015_s16 = scalar_lea.sflag [#allocation4], %s232_s7  ;;  %s1013_s14 = int_to_ptr.vmem [resolvable:$true] %s244_s14 }
  0x13   : > { %s795_s17 = scalar_lea.hbm %s1005_s12, 2048  ;;  %p797_p11 = pneg %p1009_p9 }
  0x14   : > { %p796_p10 = scmp.ne.s32.totalorder %s1005_s12, %s795_s17  ;;  %s800_s20 = scalar_lea.hbm %s1133_s4, 4096 }
  0x15   : > { %p801_p0 = scmp.lt.u32.totalorder %s1005_s12, %s1133_s4  ;;  %p802_p1 = scmp.lt.u32.totalorder %s800_s20, %s795_s17 }
  0x16   : > { %p798_p12 = pnand %p797_p11, %p796_p10  ;;  %p804_p3 = scmp.lt.u32.totalorder %s795_s17, %s1005_s12 }
  0x17   : > { %p803_p2 = por %p802_p1, %p801_p0 }
  0x18   : > { %p799_p13 = pneg %p798_p12 }
  0x19   : > { %p805_p4 = por %p804_p3, %p803_p2 }
  0x1b   : > { %p806_p5 = pnand %p805_p4, %p799_p13 }
  0x1d   : > { %809 = shalt.err (!%p806_p5)
}
  0x1e   : > { %s810_s29 = scalar_lea.vmem %s1013_s14, 2048  ;;  %s907_s7 = smov [#allocation3]  }
  0x1f   : > { %p811_p6 = scmp.ne.s32.totalorder %s1013_s14, %s810_s29  ;;  %s815_s8 = sshll.u32 %s907_s7, 4  ;;  %s816_s8 = int_to_ptr.vmem [resolvable:$false] %s815_s8 }
  0x20   : > { %s817_s9 = scalar_lea.vmem %s816_s8, 4096  ;;  %p818_p12 = scmp.lt.s32.totalorder %s1013_s14, %s816_s8 }
  0x21   : > { %p813_p8 = pnand %p811_p6, %p797_p11  ;;  %p819_p0 = scmp.lt.s32.totalorder %s817_s9, %s810_s29 }
  0x23   : > { %p814_p10 = pneg %p813_p8  ;;  %p820_p1 = por %p819_p0, %p818_p12 }
  0x25   : > { %p821_p2 = pnand %p820_p1, %p814_p10 }
  0x27   : > { %824 = shalt.err (!%p821_p2)
}
  0x28   : > { %s908_s10 = smov 128   ;;  %s909_s11 = smov 8  }
  0x29   : > { %713 = dma.hbm_to_vmem [thread:$0]  (!%p1009_p9), %s1005_s12, 2048, %s1013_s14, %s1015_s16, %s908_s10, %s908_s10, %s909_s11  }
  0x2a   : > { %p677_p11 = scmp.ge.s32.totalorder %s905_s25, 1  ;;  %p252_p13 = scmp.lt.s32.totalorder %s905_s25, 3 }
  0x2c   : > { %p253_p3 = pnand %p677_p11, %p252_p13 }
  0x2d   : > { %s258_s13 = sand.u32 (!%p253_p3), 1, %s889_s21  }
  0x2e   : > { %256 = sbr.rel (%p253_p3) target bundleno = 581 (0x245), region = 40  ;;  %s678_s17 = sshll.u32 (!%p253_p3), %s258_s13, 7 }
  0x2f   : > { %s259_s18 = scalar_lea.sflag (!%p253_p3), [#allocation4], %s258_s13  ;;  %s1046_s19 = scalar_lea.vmem (!%p253_p3), [#allocation3], %s678_s17 }
  0x35   : > { %876 = dma.done.wait (%p992_p7), %s259_s18, 2048  }
  0x36   : > { %878 = vsyncadd (%p992_p7), %s259_s18, 4294965248  ;;  %p312_p4 = scmp.lt.s32.totalorder %s897_s23, 1  ;;  %p680_p9 = scmp.ne.s32.totalorder %s897_s23, 0 }
  0x37   : > { %v324_v0 = vld [vmem:[%s1131_s2] sm:$0xf] (!%p680_p9) }
  0x38   : > { %s313_s12 = scalar_select %p312_p4, %s897_s23, 1 }
  0x39   : > { %323 = sbr.rel (%p680_p9) target bundleno = 64 (0x40), region = 48  ;;  %325 = vst [vmem:[#allocation6] sm:$0xf] (!%p680_p9), %v324_v0 }
  0x3a   : > { %s679_s14 = sshll.u32 %s313_s12, 1 }
  0x3b   : > { %s1057_s20 = scalar_lea.vmem %s1132_s3, %s679_s14 }
  0x40 PF: > { %v771_v1 = vld [vmem:[%s1046_s19 + $0x4] ss:$8 sps:$4 sm:$0xff]   ;;  %v773_v2 = vld [vmem:[%s1046_s19] ss:$8 sps:$4 sm:$0xff]   ;;  %v774_v3 = vld [vmem:[%s1046_s19 + $0x14] ss:$8 sps:$4 sm:$0xff]   ;;  %v355_v6 = vlaneseq }
  0x41   : > { %448 = vmatprep.subr.bf16.mxu0 %v771_v1  ;;  %v910_v4 = vmov 1966171168   ;;  %495 = vmatprep.subr.bf16.mxu1 %v771_v1  ;;  %v776_v7 = vld [vmem:[%s1046_s19 + $0x10] ss:$8 sps:$4 sm:$0xff]   ;;  %v777_v8 = vld [vmem:[%s1046_s19 + $0x24] ss:$8 sps:$4 sm:$0xff]  }
  0x42   : > { %v353_v5 = vunpack.c.l.s4 %v910_v4  ;;  %449 = vmatpush1.bf16.xpose.msra.mxu0 %v773_v2  ;;  %496 = vmatpush1.bf16.msra.mxu1 %v773_v2  ;;  %v356_v10 = vshrl.u32 %v355_v6, 7  ;;  %v779_v11 = vld [vmem:[%s1046_s19 + $0x20] ss:$8 sps:$4 sm:$0xff]   ;;  %v780_v12 = vld [vmem:[%s1046_s19 + $0x34] ss:$8 sps:$4 sm:$0xff]   ;;  %v911_v27 = vmov 0  }
  0x43   : > { %450 = vmatprep.subr.bf16.mxu0 %v774_v3  ;;  %497 = vmatprep.subr.bf16.mxu1 %v774_v3  ;;  %v681_v14 = vld.sshfl [vmem:[%s1130_s1] sm:$0x11 pattern:$0x75316420]  ;;  %v782_v16 = vld [vmem:[%s1046_s19 + $0x30] ss:$8 sps:$4 sm:$0xff]  }
  0x44   : > { %v354_v9 = vunpack.c.0.s8 %v353_v5  ;;  %v351_v15 = vcombine.high %v681_v14, %v681_v14  ;;  %v783_v17 = vld [vmem:[%s1046_s19 + $0x44] ss:$8 sps:$4 sm:$0xff]   ;;  %v785_v19 = vld [vmem:[%s1046_s19 + $0x40] ss:$8 sps:$4 sm:$0xff]   ;;  %v786_v20 = vld [vmem:[%s1046_s19 + $0x54] ss:$8 sps:$4 sm:$0xff]   ;;  %527 = vmatprep.mubr.bf16.mxu1 %v911_v27 }
  0x45   : > { %v788_v21 = vld [vmem:[%s1046_s19 + $0x50] ss:$8 sps:$4 sm:$0xff]   ;;  %v789_v22 = vld [vmem:[%s1046_s19 + $0x64] ss:$8 sps:$4 sm:$0xff]   ;;  %v791_v23 = vld [vmem:[%s1046_s19 + $0x60] ss:$8 sps:$4 sm:$0xff]  }
  0x46   : > { %498 = vmatpush1.bf16.msra.mxu1 %v776_v7  ;;  %v357_v13 = vsub.s32 %v354_v9, %v356_v10  ;;  %v792_v24 = vld [vmem:[%s1046_s19 + $0x74] ss:$8 sps:$4 sm:$0xff]   ;;  %v794_v25 = vld [vmem:[%s1046_s19 + $0x70] ss:$8 sps:$4 sm:$0xff]   ;;  %s490_s29 = sld [smem:[#allocation2]]  ;;  %s913_s7 = smov [#allocation6]  }
  0x47   : > { %499 = vmatprep.subr.bf16.mxu1 %v777_v8  ;;  %v488_v28 = vld [vmem:[%s1057_s20] sm:$0x3]  ;;  %v912_v37 = vmov 1983009808   ;;  %s559_s8 = sshll.u32 %s913_s7, 4  ;;  %p1085_p7 = scmp.eq.s32.totalorder %s668_s0, 1  ;;  %s560_s8 = int_to_ptr.vmem [resolvable:$true] %s559_s8 }
  0x48   : > { %v365_v18 = vrot.slane %v351_v15, %v357_v13  ;;  %v358_v26 = vrot.slane %v681_v14, %v357_v13  ;;  %v540_v38 = vunpack.c.l.s4 %v912_v37  ;;  %v493_v46 = vld [vmem:[#allocation6] sm:$0xf]  ;;  %s825_s10 = scalar_lea.vmem %s560_s8, 64  ;;  %p832_p10 = scmp.lt.s32.totalorder %s560_s8, %s560_s8 }
  0x49   : > { %p826_p5 = scmp.ne.s32.totalorder %s560_s8, %s825_s10  ;;  %p833_p12 = scmp.lt.s32.totalorder %s825_s10, %s825_s10 }
  0x4a   : > { %451 = vmatpush1.bf16.xpose.msra.mxu0 %v776_v7  ;;  %500 = vmatpush1.bf16.msra.mxu1 %v779_v11  ;;  %v541_v39 = vunpack.c.0.s8 %v540_v38 }
  0x4b   : > { %452 = vmatprep.subr.bf16.mxu0 %v777_v8  ;;  %501 = vmatprep.subr.bf16.mxu1 %v780_v12  ;;  %p827_p6 = pnand %p826_p5, %p1085_p7  ;;  %p834_p0 = por %p833_p12, %p832_p10 }
  0x4c   : > { %480 = vmatprep.mubr.bf16.mxu0 %v365_v18  ;;  %v491_v30 = vstv %s490_s29  ;;  %v544_v41 = vsub.s32 %v541_v39, %v356_v10 }
  0x4d   : > { %p828_p8 = pneg %p827_p6 }
  0x4e   : > { %502 = vmatpush1.bf16.msra.mxu1 %v782_v16 }
  0x4f   : > { %503 = vmatprep.subr.bf16.mxu1 %v783_v17  ;;  %p835_p1 = pnand %p834_p0, %p828_p8 }
  0x52   : > { %453 = vmatpush1.bf16.xpose.msra.mxu0 %v779_v11  ;;  %504 = vmatpush1.bf16.msra.mxu1 %v785_v19 }
  0x53   : > { %454 = vmatprep.subr.bf16.mxu0 %v780_v12  ;;  %505 = vmatprep.subr.bf16.mxu1 %v786_v20 }
  0x56   : > { %506 = vmatpush1.bf16.msra.mxu1 %v788_v21 }
  0x57   : > { %507 = vmatprep.subr.bf16.mxu1 %v789_v22 }
  0x5a   : > { %455 = vmatpush1.bf16.xpose.msra.mxu0 %v782_v16  ;;  %508 = vmatpush1.bf16.msra.mxu1 %v791_v23 }
  0x5b   : > { %456 = vmatprep.subr.bf16.mxu0 %v783_v17  ;;  %509 = vmatprep.subr.bf16.mxu1 %v792_v24 }
  0x5e   : > { %510 = vmatpush1.bf16.msra.mxu1 %v794_v25 }
  0x62   : > { %457 = vmatpush1.bf16.xpose.msra.mxu0 %v785_v19 }
  0x63   : > { %458 = vmatprep.subr.bf16.mxu0 %v786_v20 }
  0x6a   : > { %459 = vmatpush1.bf16.xpose.msra.mxu0 %v788_v21 }
  0x6b   : > { %460 = vmatprep.subr.bf16.mxu0 %v789_v22 }
  0x72   : > { %461 = vmatpush1.bf16.xpose.msra.mxu0 %v791_v23 }
  0x73   : > { %462 = vmatprep.subr.bf16.mxu0 %v792_v24 }
  0x7a   : > { %463 = vmatpush1.bf16.xpose.msra.mxu0 %v794_v25 }
  0x81   : > { %481 = vmatmul.mubr.bf16.vlgmr.msra.gmra.mrb[0].mxu0 %v358_v26 }
 0x154   : > { %v482_v29 = vpop.f32.mrb[0].mxu0 }
 0x155   : > { %v489_v31 = vsub.f32 %v488_v28, %v482_v29  ;;  %v484_v32 = vpop.f32.mrb[1].mxu0 }
 0x156   : > { %v485_v33 = vpop.f32.mrb[2].mxu0 }
 0x157   : > { %v492_v34 = vmul.f32 %v491_v30, %v489_v31  ;;  %v486_v35 = vpop.f32.mrb[3].mxu0 }
 0x159   : > { %v494_v36 = vpack.c.bf16 %v492_v34, %v492_v34 }
 0x15b   : > { %528 = vmatmul.mubr.bf16.vlgmr.msra.gmra.mrb[0].mxu1 %v494_v36 }
 0x22e   : > { %v529_v40 = vpop.f32.mrb[0].mxu1 }
 0x22f   : > { %v531_v42 = vpop.f32.mrb[1].mxu1 }
 0x230   : > { %v538_v43 = vcombine.low %v529_v40, %v531_v42  ;;  %v533_v44 = vpop.f32.mrb[2].mxu1 }
 0x231   : > { %v534_v45 = vpop.f32.mrb[3].mxu1 }
 0x232   : > { %v545_v47 = vrot.slane %v538_v43, %v544_v41 }
 0x234   : > { %v547_v48 = vadd.f32 %v545_v47, %v493_v46 }
 0x236   : > { %548 = vst [vmem:[#allocation6] sm:$0xf] %v547_v48 }
 0x237   : > { %838 = shalt.err (!%p835_p1)
}
 0x238   : > { %s839_s0 = scalar_lea.hbm %s1134_s5, 64 }
 0x239   : > { %p840_p2 = scmp.ne.s32.totalorder %s1134_s5, %s839_s0  ;;  %p845_p3 = scmp.lt.u32.totalorder %s839_s0, %s1134_s5 }
 0x23b   : > { %p841_p11 = pnand %p840_p2, %p1085_p7 }
 0x23d   : > { %p842_p13 = pneg %p841_p11 }
 0x23f   : > { %p847_p4 = pnand %p845_p3, %p842_p13 }
 0x241   : > { %850 = shalt.err (!%p847_p4)
}
 0x242   : > { %707 = dma.vmem_to_hbm [thread:$0]  (%p1085_p7), %s560_s8, 64, %s1134_s5, [#allocation5]  }
 0x243   : > { %880 = dma.done.wait (%p1085_p7), [#allocation5], 64  }
 0x244   : > { %882 = vsyncadd (%p1085_p7), [#allocation5], 4294967232 }
 0x245 PF: > { %s20_s25 = sadd.s32 1, %s905_s25   ;;  %s1139_s20 = smov %s889_s21 }
 0x246   : > { %p17_p9 = scmp.ge.s32.totalorder %s20_s25, 4   ;;  %s1140_s21 = smov %s893_s22 }
 0x247   : > { %s1141_s22 = smov %s998_s6  ;;  %s1142_s23 = smov %s901_s24 }
 0x248   : > { %s1143_s24 = smov %s1145_s26  ;;  %19 = sbr.rel (!%p17_p9) target bundleno = 7 (0x7), region = 91 }
 0x24f   :  { %572 = vsyncpa [#allocation4], 1 }
 0x250   :  { %574 = vsyncpa [#allocation4 + $0x1], 1 }
 0x251   :  { %575 = vsyncpa [#allocation5], 1 }
 0x252   :  { %577 = vsyncpa [#allocation5 + $0x1], 1 }

</bundles_post_ra>
